<compile_context>
chip_gen: v7x
topology: tpu7x:2x2x1
jax: 0.10.0
libtpu: 0.0.40
codegen_flags: <defaults>
</compile_context>

<pallas_src>
import functools

import jax
import jax.numpy as jnp
from jax.experimental import pallas as pl
from jax.experimental.pallas import tpu as pltpu


def _fused_proj_ln_kernel(x_ref, w_ref, b_ref, g_ref, beta_ref, o_ref, *, eps):
    """One grid step: (B, K) @ (K, tt*C) + bias -> fp32 LN over C -> (B, tt*C)."""
    B = x_ref.shape[0]
    C = g_ref.shape[-1]
    n_blk = w_ref.shape[-1]
    tt = n_blk // C

    # MXU matmul (bf16 inputs when streamed that way) with f32 accumulation.
    # The accumulator stays f32 all the way through the LayerNorm.
    acc = jnp.dot(x_ref[...], w_ref[...], preferred_element_type=jnp.float32)
    acc = acc + b_ref[...].astype(jnp.float32)          # bias broadcast over rows

    gamma = g_ref[...].astype(jnp.float32)              # (1, C)
    beta = beta_ref[...].astype(jnp.float32)             # (1, C)

    if B < 8:
        # Small batch: fold tokens into rows so the VPU/EUP epilogue works on
        # full (8, 128) vregs instead of B (tiny) sublane-padded rows.
        rows = acc.reshape(B * tt, C)
        mean = jnp.mean(rows, axis=-1, keepdims=True)
        xc = rows - mean
        var = jnp.mean(xc * xc, axis=-1, keepdims=True)
        y = xc * jax.lax.rsqrt(var + eps) * gamma + beta
        o_ref[...] = y.reshape(B, n_blk).astype(o_ref.dtype)
    else:
        # Batch already fills the sublanes; skip the lane->sublane fold and
        # reduce directly over the channel axis.
        acc3 = acc.reshape(B, tt, C)
        mean = jnp.mean(acc3, axis=-1, keepdims=True)
        xc = acc3 - mean
        var = jnp.mean(xc * xc, axis=-1, keepdims=True)
        y = (xc * jax.lax.rsqrt(var + eps) * gamma.reshape(1, 1, C)
             + beta.reshape(1, 1, C))
        o_ref[...] = y.reshape(B, n_blk).astype(o_ref.dtype)


def _pick_token_tile(T, C, vmem_cost_fn, budget, prefer_multi_step):
    """Largest divisor tt of T that is (8,128)-legal and fits the joint budget.

    If prefer_multi_step (v7x: 2 TensorCores), prefer the largest fitting tt
    that still leaves >= 2 grid steps so both cores stream disjoint W tiles.
    Falls back to the smallest legal divisor if nothing fits (correctness over
    budget; vmem_limit_bytes is raised accordingly)."""
    def legal(tt):
        # W / bias / output blocks end in tt*C lanes: must be a multiple of
        # 128 or span the full N = T*C.
        return tt == T or (tt * C) % 128 == 0

    divisors = [d for d in range(1, T + 1) if T % d == 0 and legal(d)]
    fitting = [d for d in divisors if vmem_cost_fn(d) <= budget]
    if not fitting:
        return min(divisors)
    if prefer_multi_step:
        multi = [d for d in fitting if T // d >= 2]
        if multi:
            return max(multi)
    return max(fitting)


def linear_image_projector(features, proj_w_t, proj_b, norm_w, norm_b,
                           *, num_ip_tokens, cross_attention_dim, eps=1e-5,
                           compute_dtype=jnp.bfloat16):
    """features: (B, in_features) -> (B, num_ip_tokens, cross_attention_dim).

    compute_dtype: dtype the matmul operands are streamed/multiplied in
    (default bf16 — halves weight HBM traffic; accumulation and LN stay f32).
    Pass None to keep the original dtypes."""
    B, K = features.shape
    T, C = num_ip_tokens, cross_attention_dim
    N = T * C
    assert proj_w_t.shape == (K, N)
    out_dtype = features.dtype

    if compute_dtype is not None:
        x = features.astype(compute_dtype)
        w = proj_w_t.astype(compute_dtype)   # in production, store W in bf16 already
    else:
        x, w = features, proj_w_t

    w_bytes = jnp.dtype(w.dtype).itemsize
    x_bytes = jnp.dtype(x.dtype).itemsize
    out_bytes = jnp.dtype(out_dtype).itemsize

    # ---- generation-aware VMEM budget ------------------------------------
    try:
        vmem_cap = int(pltpu.get_tpu_info().vmem_capacity_bytes)
    except Exception:
        vmem_cap = 64 << 20                      # conservative fallback (v7x-sized)
    # Joint budget for all pipeline buffers; leave headroom for compiler
    # internal scratch.  v5e/v6e (128 MiB): 64 MiB; v7x (64 MiB/TC): ~38 MiB.
    budget = min((vmem_cap * 3) // 5, 64 << 20)
    # v7x exposes 64 MiB VMEM per TensorCore and has 2 TCs per chip: prefer
    # >= 2 parallel grid steps there so both cores stream weight tiles.
    prefer_multi_step = vmem_cap <= (64 << 20)

    def vmem_needed(tt):
        n_blk = tt * C
        return (2 * K * n_blk * w_bytes          # W double buffer (streamed)
                + 2 * B * K * x_bytes            # x (resident; counted as a pair)
                + 2 * n_blk * 4                  # bias (f32) double buffer
                + 2 * B * n_blk * out_bytes      # output double buffer
                + B * n_blk * 4                  # f32 accumulator / LN temps
                + 4 * C * 4)                     # gamma / beta

    tt = _pick_token_tile(T, C, vmem_needed, budget, prefer_multi_step)
    grid = (T // tt,)

    vmem_limit = min(vmem_cap, max(vmem_needed(tt) + (4 << 20), 32 << 20))

    est_flops = 2 * B * K * N
    est_bytes = (K * N * w_bytes + B * K * x_bytes + B * N * out_bytes
                 + N * 4 + 2 * C * 4)

    kernel = functools.partial(_fused_proj_ln_kernel, eps=eps)

    out2d = pl.pallas_call(
        kernel,
        out_shape=jax.ShapeDtypeStruct((B, N), out_dtype),
        grid_spec=pltpu.PrefetchScalarGridSpec(
            num_scalar_prefetch=0,
            grid=grid,
            in_specs=[
                pl.BlockSpec((B, K), lambda j: (0, 0)),        # x (resident, one DMA)
                pl.BlockSpec((K, tt * C), lambda j: (0, j)),   # W tile (streamed once)
                pl.BlockSpec((1, tt * C), lambda j: (0, j)),   # bias tile
                pl.BlockSpec((1, C), lambda j: (0, 0)),        # LN gamma (resident)
                pl.BlockSpec((1, C), lambda j: (0, 0)),        # LN beta  (resident)
            ],
            out_specs=pl.BlockSpec((B, tt * C), lambda j: (0, j)),
        ),
        compiler_params=pltpu.CompilerParams(
            dimension_semantics=("parallel",),
            vmem_limit_bytes=vmem_limit),
        cost_estimate=pl.CostEstimate(flops=est_flops,
                                      transcendentals=B * T,
                                      bytes_accessed=est_bytes),
    )(x, w,
      proj_b.reshape(1, N).astype(jnp.float32),
      norm_w.reshape(1, C).astype(jnp.float32),
      norm_b.reshape(1, C).astype(jnp.float32))

    # Free, contiguous view: (B, T*C) -> (B, T, C)
    return out2d.reshape(B, T, C)


def _reference(features, proj_w_t, proj_b, norm_w, norm_b, T, C, eps=1e-5,
               compute_dtype=jnp.bfloat16):
    """Pure-JAX reference mirroring the kernel's bf16 matmul inputs + fp32 LN."""
    if compute_dtype is not None:
        x = features.astype(compute_dtype).astype(jnp.float32)
        w = proj_w_t.astype(compute_dtype).astype(jnp.float32)
    else:
        x, w = features.astype(jnp.float32), proj_w_t.astype(jnp.float32)
    y = x @ w + proj_b.astype(jnp.float32)
    y = y.reshape(-1, T, C)
    mean = jnp.mean(y, axis=-1, keepdims=True)
    var = jnp.mean((y - mean) ** 2, axis=-1, keepdims=True)
    y = ((y - mean) * jax.lax.rsqrt(var + eps) * norm_w.astype(jnp.float32)
         + norm_b.astype(jnp.float32))
    return y.astype(features.dtype)


if __name__ == "__main__":
    # Small shapes consistent with the module (num_ip_tokens=4).
    B, in_features = 2, 32
    cross_attention_dim, num_ip_tokens = 256, 4
    N = cross_attention_dim * num_ip_tokens

    key = jax.random.PRNGKey(0)
    k_feat, k_w = jax.random.split(key)

    features = jax.random.normal(k_feat, (B, in_features), dtype=jnp.float32)

    # Deterministic init mirroring init_weights():
    #   proj.weight ~ U(0, 0.02), proj.bias = 0, norm.weight = 1, norm.bias = 0
    proj_w = jax.random.uniform(k_w, (N, in_features), dtype=jnp.float32,
                                minval=0.0, maxval=0.02)     # torch (out, in)
    # Stream the projection weight in bf16 (kernel is weight-HBM-bound); the
    # matmul accumulates in f32 and the LayerNorm is fully f32.
    proj_w_t = proj_w.T.astype(jnp.bfloat16)                  # kernel layout (in, out)
    proj_b = jnp.zeros((N,), dtype=jnp.float32)
    norm_w = jnp.ones((cross_attention_dim,), dtype=jnp.float32)
    norm_b = jnp.zeros((cross_attention_dim,), dtype=jnp.float32)

    out = linear_image_projector(
        features, proj_w_t, proj_b, norm_w, norm_b,
        num_ip_tokens=num_ip_tokens, cross_attention_dim=cross_attention_dim)
    out = jax.block_until_ready(out)

    ref = _reference(features, proj_w_t, proj_b, norm_w, norm_b,
                     num_ip_tokens, cross_attention_dim)

    assert out.shape == (B, num_ip_tokens, cross_attention_dim)
    assert out.dtype == features.dtype
    max_err = float(jnp.max(jnp.abs(out.astype(jnp.float32) - ref.astype(jnp.float32))))
    assert jnp.allclose(out, ref, atol=5e-4, rtol=5e-4), max_err

    print("KERNEL_OK")
</pallas_src>

<mosaic_0001>
module attributes {stable_mosaic.version = 11 : i64} {
  func.func @_fused_proj_ln_kernel(%arg0: i32, %arg1: memref<2x32xbf16, #tpu.memory_space<vmem>>, %arg2: memref<32x512xbf16, #tpu.memory_space<vmem>>, %arg3: memref<1x512xf32, #tpu.memory_space<vmem>>, %arg4: memref<1x256xf32, #tpu.memory_space<vmem>>, %arg5: memref<1x256xf32, #tpu.memory_space<vmem>>, %arg6: memref<2x512xf32, #tpu.memory_space<vmem>>) attributes {dimension_semantics = [#tpu.dimension_semantics<parallel>], iteration_bounds = array<i64: 2>, scalar_prefetch = 0 : i64, scratch_operands = 0 : i64, tpu.core_type = #tpu.core_type<tc>, window_params = [{pipeline_mode = #tpu.pipeline_mode<synchronous>, transform_indices = @transform_0, window_bounds = array<i64: 2, 32>}, {transform_indices = @transform_1, window_bounds = array<i64: 32, 512>}, {transform_indices = @transform_2, window_bounds = array<i64: 1, 512>}, {pipeline_mode = #tpu.pipeline_mode<synchronous>, transform_indices = @transform_3, window_bounds = array<i64: 1, 256>}, {pipeline_mode = #tpu.pipeline_mode<synchronous>, transform_indices = @transform_4, window_bounds = array<i64: 1, 256>}, {transform_indices = @transform_5, window_bounds = array<i64: 2, 512>}]} {
    %c0 = arith.constant 0 : index
    %c0_0 = arith.constant 0 : index
    %0 = vector.load %arg1[%c0, %c0_0] : memref<2x32xbf16, #tpu.memory_space<vmem>>, vector<2x32xbf16>
    %c0_1 = arith.constant 0 : index
    %c0_2 = arith.constant 0 : index
    %1 = vector.load %arg2[%c0_1, %c0_2] : memref<32x512xbf16, #tpu.memory_space<vmem>>, vector<32x512xbf16>
    %cst = arith.constant dense<0.000000e+00> : vector<2x512xf32>
    %2 = tpu.matmul %0, %1, %cst {dimension_numbers = #tpu.dot_dimension_numbers<[1], [0], [0], [1], [0, 0, 1, 1], [], []>} : vector<2x32xbf16>, vector<32x512xbf16>, vector<2x512xf32> -> vector<2x512xf32>
    %c0_3 = arith.constant 0 : index
    %c0_4 = arith.constant 0 : index
    %3 = vector.load %arg3[%c0_3, %c0_4] : memref<1x512xf32, #tpu.memory_space<vmem>>, vector<1x512xf32>
    %4 = vector.broadcast %3 : vector<1x512xf32> to vector<2x512xf32>
    %5 = arith.addf %2, %4 : vector<2x512xf32>
    %c0_5 = arith.constant 0 : index
    %c0_6 = arith.constant 0 : index
    %6 = vector.load %arg4[%c0_5, %c0_6] : memref<1x256xf32, #tpu.memory_space<vmem>>, vector<1x256xf32>
    %c0_7 = arith.constant 0 : index
    %c0_8 = arith.constant 0 : index
    %7 = vector.load %arg5[%c0_7, %c0_8] : memref<1x256xf32, #tpu.memory_space<vmem>>, vector<1x256xf32>
    %8 = vector.shape_cast %5 : vector<2x512xf32> to vector<4x256xf32>
    %cst_9 = arith.constant dense<0.000000e+00> : vector<4xf32>
    %9 = vector.multi_reduction <add>, %8, %cst_9 [1] : vector<4x256xf32> to vector<4xf32>
    %10 = vector.shape_cast %9 : vector<4xf32> to vector<4x1xf32>
    %cst_10 = arith.constant 2.560000e+02 : f32
    %11 = vector.broadcast %cst_10 : f32 to vector<4x1xf32>
    %12 = arith.divf %10, %11 : vector<4x1xf32>
    %13 = vector.broadcast %12 : vector<4x1xf32> to vector<4x256xf32>
    %14 = arith.subf %8, %13 : vector<4x256xf32>
    %15 = arith.mulf %14, %14 : vector<4x256xf32>
    %cst_11 = arith.constant dense<0.000000e+00> : vector<4xf32>
    %16 = vector.multi_reduction <add>, %15, %cst_11 [1] : vector<4x256xf32> to vector<4xf32>
    %17 = vector.shape_cast %16 : vector<4xf32> to vector<4x1xf32>
    %cst_12 = arith.constant 2.560000e+02 : f32
    %18 = vector.broadcast %cst_12 : f32 to vector<4x1xf32>
    %19 = arith.divf %17, %18 : vector<4x1xf32>
    %cst_13 = arith.constant 9.99999974E-6 : f32
    %20 = vector.broadcast %cst_13 : f32 to vector<4x1xf32>
    %21 = arith.addf %19, %20 : vector<4x1xf32>
    %22 = math.rsqrt %21 : vector<4x1xf32>
    %23 = vector.broadcast %22 : vector<4x1xf32> to vector<4x256xf32>
    %24 = arith.mulf %14, %23 : vector<4x256xf32>
    %25 = vector.broadcast %6 : vector<1x256xf32> to vector<4x256xf32>
    %26 = arith.mulf %24, %25 : vector<4x256xf32>
    %27 = vector.broadcast %7 : vector<1x256xf32> to vector<4x256xf32>
    %28 = arith.addf %26, %27 : vector<4x256xf32>
    %29 = vector.shape_cast %28 : vector<4x256xf32> to vector<2x512xf32>
    %c0_14 = arith.constant 0 : index
    %c0_15 = arith.constant 0 : index
    %30 = vector.load %arg6[%c0_14, %c0_15] : memref<2x512xf32, #tpu.memory_space<vmem>>, vector<2x512xf32>
    tpu.vector_store %arg6[%c0_14, %c0_15], %29 {strides = array<i32>} : memref<2x512xf32, #tpu.memory_space<vmem>>, vector<2x512xf32>,
    return
  }
  func.func @transform_0(%arg0: i32) -> (i32, i32) {
    %c0_i32 = arith.constant 0 : i32
    %c0_i32_0 = arith.constant 0 : i32
    %c0_i32_1 = arith.constant 0 : i32
    return %c0_i32, %c0_i32_0 : i32, i32
  }
  func.func @transform_1(%arg0: i32) -> (i32, i32) {
    %c0_i32 = arith.constant 0 : i32
    %c0_i32_0 = arith.constant 0 : i32
    return %c0_i32, %arg0 : i32, i32
  }
  func.func @transform_2(%arg0: i32) -> (i32, i32) {
    %c0_i32 = arith.constant 0 : i32
    %c0_i32_0 = arith.constant 0 : i32
    return %c0_i32, %arg0 : i32, i32
  }
  func.func @transform_3(%arg0: i32) -> (i32, i32) {
    %c0_i32 = arith.constant 0 : i32
    %c0_i32_0 = arith.constant 0 : i32
    %c0_i32_1 = arith.constant 0 : i32
    return %c0_i32, %c0_i32_0 : i32, i32
  }
  func.func @transform_4(%arg0: i32) -> (i32, i32) {
    %c0_i32 = arith.constant 0 : i32
    %c0_i32_0 = arith.constant 0 : i32
    %c0_i32_1 = arith.constant 0 : i32
    return %c0_i32, %c0_i32_0 : i32, i32
  }
  func.func @transform_5(%arg0: i32) -> (i32, i32) {
    %c0_i32 = arith.constant 0 : i32
    %c0_i32_0 = arith.constant 0 : i32
    return %c0_i32, %arg0 : i32, i32
  }
}

</mosaic_0001>

<bundles_post_ra>
// kernel: tpu_custom_call.1
= control target key start
LH: loop header
LB: loop body
LE: loop exit
PB: predicated region body
PF: predicated region fallthrough
CT: control target
= control target key end

     0   :  { %s1248_s0 = inlined_call_operand.hbm [shape: bf16[2,32], index: 0, kind: input, shape index: {}]   ;;  %s1249_s1 = inlined_call_operand.hbm [shape: bf16[32,1024], index: 1, kind: input, shape index: {}]   ;;  %s1250_s2 = inlined_call_operand.hbm [shape: f32[1,1024], index: 2, kind: input, shape index: {}]   ;;  %s1251_s3 = inlined_call_operand.vmem [shape: f32[1,256], index: 3, kind: input, shape index: {}]   ;;  %s1252_s4 = inlined_call_operand.vmem [shape: f32[1,256], index: 4, kind: input, shape index: {}]   ;;  %s1253_s5 = inlined_call_operand.hbm [shape: f32[2,1024], index: 5, kind: output, shape index: {}]  }
   0x1   :  { %1261 = sst [smem:[#allocation13_spill]] %s1249_s1 }
   0x2   :  { %10 = vsyncpa [#allocation3], 0 }
   0x3   :  { %11 = vsyncpa [#allocation6], 0 }
   0x4   :  { %13 = vsyncpa [#allocation6 + $0x1], 0 }
   0x5   :  { %14 = vsyncpa [#allocation4], 0 }
   0x6   :  { %16 = vsyncpa [#allocation4 + $0x1], 0  ;;  %s993_s18 = smov 0   ;;  %s995_s19 = smov 0  }
   0x7   :  { %s997_s20 = smov 0   ;;  %s999_s21 = smov 0  }
   0x8 LB: > { %s1014_s22 = sadd.s32 1, %s950_s21   ;;  %s50_s23 = sadd.s32 1, %s946_s20  ;;  %s950_s21 = sphi %s999_s21, %s1284_s21   ;;  %s946_s20 = sphi %s997_s20, %s1283_s20   ;;  %s942_s19 = sphi %s995_s19, %s1282_s19   ;;  %s938_s18 = sphi %s993_s18, %s1281_s18  }
   0x9   : > { %s47_s24 = ssub.s32 %s950_s21, %s1014_s22  ;;  %p57_p0 = scmp.ne.s32.totalorder %s946_s20, %s942_s19 }
   0xa   : > { %p48_p1 = scmp.eq.s32.totalorder %s47_s24, 0  ;;  %p58_p2 = scmp.eq.s32.totalorder %s950_s21, 0 }
   0xb   : > { %p735_p4 = scmp.lt.s32.totalorder %s950_s21, 2  ;;  %s198_s26 = sand.u32 1, %s950_s21  }
   0xc   : > { %s1025_s25 = scalar_select %p48_p1, %s946_s20, %s50_s23  }
   0xd   : > { %p59_p5 = por %p58_p2, %p57_p0  ;;  %s200_s27 = sand.u32 1, %s946_s20  }
   0xe   : > { %1262 = sst [smem:[#allocation12_spill]] %s1025_s25  ;;  %s679_s28 = sshll.u32 %s200_s27, 6 }
   0xf   : > { %s706_s29 = sshll.u32 %s950_s21, 8  ;;  %s1263_s1 = sld [smem:[#allocation13_spill]] }
  0x10   : > { %s202_s8 = scalar_lea.vmem [#allocation5], %s679_s28  ;;  %p1040_p6 = pnand %p735_p4, %p59_p5 }
  0x11   : > { %s209_s9 = sshll.u32 %s202_s8, 4  ;;  %s1046_s11 = scalar_lea.sflag [#allocation6], %s198_s26  ;;  %s1044_s9 = int_to_ptr.vmem [resolvable:$true] %s209_s9 }
  0x12   : > { %s1264_s10 = scalar_select %p1040_p6, 1, 0 }
  0x13   : > { %p1255_p8 = pneg %p1040_p6 }
  0x15   : > { %s1038_s7 = scalar_lea.hbm %s1263_s1, %s706_s29  ;;  %s797_s15 = scalar_lea.hbm %s1263_s1, 2048 }
  0x16   : > { %s792_s12 = scalar_lea.hbm %s1038_s7, 1024  ;;  %p798_p11 = scmp.lt.u32.totalorder %s1038_s7, %s1263_s1 }
  0x17   : > { %p793_p7 = scmp.ne.s32.totalorder %s1038_s7, %s792_s12  ;;  %p799_p12 = scmp.lt.u32.totalorder %s797_s15, %s792_s12 }
  0x18   : > { %p801_p1 = scmp.lt.u32.totalorder %s792_s12, %s1038_s7 }
  0x19   : > { %p795_p9 = pnand %p1255_p8, %p793_p7  ;;  %p800_p13 = por %p799_p12, %p798_p11 }
  0x1b   : > { %p796_p10 = pneg %p795_p9  ;;  %p802_p2 = por %p801_p1, %p800_p13 }
  0x1d   : > { %p803_p4 = pnand %p802_p2, %p796_p10 }
  0x1f   : > { %806 = shalt.err (!%p803_p4)
}
  0x20   : > { %s807_s23 = scalar_lea.vmem %s1044_s9, 1024  ;;  %s952_s24 = smov [#allocation5]  }
  0x21   : > { %p808_p5 = scmp.ne.s32.totalorder %s1044_s9, %s807_s23  ;;  %s812_s26 = sshll.u32 %s952_s24, 4  ;;  %s813_s26 = int_to_ptr.vmem [resolvable:$false] %s812_s26 }
  0x22   : > { %s814_s28 = scalar_lea.vmem %s813_s26, 2048  ;;  %p815_p3 = scmp.lt.s32.totalorder %s1044_s9, %s813_s26 }
  0x23   : > { %p810_p7 = pnand %p808_p5, %p1255_p8  ;;  %p816_p11 = scmp.lt.s32.totalorder %s814_s28, %s807_s23 }
  0x25   : > { %p811_p9 = pneg %p810_p7  ;;  %p817_p12 = por %p816_p11, %p815_p3 }
  0x27   : > { %p818_p13 = pnand %p817_p12, %p811_p9 }
  0x29   : > { %821 = shalt.err (!%p818_p13)
}
  0x2a   : > { %s953_s29 = smov 512   ;;  %s954_s30 = smov 256  }
  0x2b   : > { %s955_s6 = smov 16   ;;  %s1075_s8 = sadd.s32 4294967295, %s950_s21  }
  0x2c   : > { %726 = dma.hbm_to_vmem [thread:$0]  (!%p1040_p6), %s1038_s7, 1024, %s1044_s9, %s1046_s11, %s953_s29, %s954_s30, %s955_s6  }
  0x2d   : > { %s675_s12 = sadd.s32 4294967294, %s950_s21   ;;  %p63_p3 = scmp.ne.s32.totalorder %s942_s19, %s938_s18 }
  0x2e   : > { %p1254_p10 = scmp.eq.s32.totalorder %s1075_s8, 0  ;;  %p155_p1 = scmp.eq.s32.totalorder %s1075_s8, 1 }
  0x2f   : > { %p161_p2 = scmp.eq.s32.totalorder %s675_s12, 1  ;;  %p676_p4 = scmp.ge.s32.totalorder %s950_s21, 1 }
  0x30   : > { %p1085_p5 = por %p1254_p10, %p63_p3  ;;  %p1092_p7 = por %p155_p1, %p57_p0 }
  0x31   : > { %p1096_p9 = por %p161_p2, %p63_p3  ;;  %p168_p11 = scmp.lt.s32.totalorder %s950_s21, 3 }
  0x32   : > { %s1265_s13 = scalar_select %p1085_p5, 1, 0 }
  0x33   : > { %s1266_s7 = scalar_select %p1092_p7, 1, 0 }
  0x34   : > { %s1267_s9 = scalar_select %p1096_p9, 1, 0 }
  0x35   : > { %p1101_p12 = pnand %p676_p4, %p168_p11  ;;  %s956_s15 = smov [#allocation2]  }
  0x36   : > { %s181_s16 = sshll.u32 %s956_s15, 4  ;;  %s682_s17 = sshll.u32 %s200_s27, 2  ;;  %s182_s16 = int_to_ptr.vmem [resolvable:$true] %s181_s16 }
  0x37   : > { %s1268_s14 = scalar_select %p1101_p12, 1, 0 }
  0x38   : > { %p719_p13 = pneg %p1101_p12  ;;  %s707_s23 = sshll.u32 %s950_s21, 6 }
  0x39   : > { %s223_s24 = scalar_lea.vmem [#allocation7], %s682_s17  ;;  %s1119_s6 = scalar_lea.hbm %s1250_s2, %s707_s23 }
  0x3a   : > { %s231_s26 = sshll.u32 %s223_s24, 4  ;;  %p1112_p0 = pnand %p719_p13, %p1254_p10  ;;  %s1121_s26 = int_to_ptr.vmem [resolvable:$true] %s231_s26 }
  0x3b   : > { %s822_s15 = scalar_lea.hbm %s1248_s0, 16 }
  0x3c   : > { %p823_p3 = scmp.ne.s32.totalorder %s1248_s0, %s822_s15  ;;  %p824_p1 = pneg %p1112_p0 }
  0x3d   : > { %p829_p11 = scmp.lt.u32.totalorder %s822_s15, %s1248_s0 }
  0x3e   : > { %p825_p2 = pnand %p824_p1, %p823_p3 }
  0x40   : > { %p826_p4 = pneg %p825_p2 }
  0x42   : > { %p831_p13 = pnand %p829_p11, %p826_p4 }
  0x44   : > { %834 = shalt.err (!%p831_p13)
}
  0x45   : > { %s835_s23 = scalar_lea.vmem %s182_s16, 16  ;;  %s842_s29 = scalar_lea.vmem %s182_s16, 32 }
  0x46   : > { %p836_p10 = scmp.ne.s32.totalorder %s182_s16, %s835_s23  ;;  %p843_p7 = scmp.lt.s32.totalorder %s182_s16, %s182_s16 }
  0x47   : > { %p844_p5 = scmp.lt.s32.totalorder %s842_s29, %s835_s23 }
  0x48   : > { %p838_p8 = pnand %p836_p10, %p824_p1 }
  0x49   : > { %p845_p12 = por %p844_p5, %p843_p7 }
  0x4a   : > { %p839_p9 = pneg %p838_p8 }
  0x4c   : > { %p846_p6 = pnand %p845_p12, %p839_p9 }
  0x4e   : > { %849 = shalt.err (!%p846_p6)
}
  0x4f   : > { %722 = dma.hbm_to_vmem [thread:$0]  (!%p1112_p0), %s1248_s0, 16, %s182_s16, [#allocation3]  }
  0x50   : > { %s850_s1 = scalar_lea.hbm %s1119_s6, 64  ;;  %p1270_p8 = scmp.ne.s32.totalorder %s1264_s10, 0 }
  0x51   : > { %p851_p10 = scmp.ne.s32.totalorder %s1119_s6, %s850_s1  ;;  %s855_s15 = scalar_lea.hbm %s1250_s2, 128 }
  0x52   : > { %p1271_p3 = pneg %p1270_p8  ;;  %p856_p6 = scmp.lt.u32.totalorder %s1119_s6, %s1250_s2 }
  0x53   : > { %p857_p5 = scmp.lt.u32.totalorder %s855_s15, %s850_s1  ;;  %p859_p9 = scmp.lt.u32.totalorder %s850_s1, %s1119_s6 }
  0x54   : > { %p853_p1 = pnand %p851_p10, %p1271_p3 }
  0x55   : > { %p858_p7 = por %p857_p5, %p856_p6 }
  0x56   : > { %p854_p2 = pneg %p853_p1 }
  0x57   : > { %p860_p12 = por %p859_p9, %p858_p7 }
  0x59   : > { %p861_p4 = pnand %p860_p12, %p854_p2 }
  0x5b   : > { %864 = shalt.err (!%p861_p4)
}
  0x5c   : > { %s865_s16 = scalar_lea.vmem %s1121_s26, 64  ;;  %p1272_p11 = pmov %p1271_p3 }
  0x5d   : > { %p866_p0 = scmp.ne.s32.totalorder %s1121_s26, %s865_s16  ;;  %s957_s24 = smov [#allocation7]  }
  0x5e   : > { %s870_s23 = sshll.u32 %s957_s24, 4  ;;  %s871_s23 = int_to_ptr.vmem [resolvable:$false] %s870_s23 }
  0x5f   : > { %p868_p13 = pnand %p866_p0, %p1272_p11  ;;  %s872_s29 = scalar_lea.vmem %s871_s23, 128 }
  0x60   : > { %p873_p3 = scmp.lt.s32.totalorder %s1121_s26, %s871_s23  ;;  %p874_p1 = scmp.lt.s32.totalorder %s872_s29, %s865_s16 }
  0x61   : > { %p869_p10 = pneg %p868_p13 }
  0x62   : > { %p875_p6 = por %p874_p1, %p873_p3 }
  0x64   : > { %p876_p5 = pnand %p875_p6, %p869_p10 }
  0x66   : > { %879 = shalt.err (!%p876_p5)
}
  0x67   : > { %729 = dma.hbm_to_vmem [thread:$0]  (!%p1270_p8), %s1119_s6, 64, %s1121_s26, %s1046_s11  }
  0x68   : > { %p1273_p2 = scmp.ne.s32.totalorder %s1268_s14, 0 }
  0x69   : > { %p1274_p7 = scmp.eq.s32.totalorder (!%p1273_p2), %s1075_s8, 0 }
  0x6a   : > { %240 = sbr.rel (%p1273_p2) target bundleno = 691 (0x2b3), region = 40 }
  0x71   : > { %925 = dma.done.wait (%p1274_p7), [#allocation3], 16   ;;  %p1275_p9 = pmov %p1274_p7 }
  0x72   : > { %s246_s30 = sand.u32 1, %s1075_s8   ;;  %s1171_s27 = sand.u32 1, %s942_s19  }
  0x73   : > { %927 = vsyncadd (%p1275_p9), [#allocation3], 4294967280  ;;  %s687_s10 = sshll.u32 %s1171_s27, 6  ;;  %s247_s1 = scalar_lea.sflag [#allocation6], %s246_s30 }
  0x74   : > { %s250_s25 = scalar_lea.vmem [#allocation5], %s687_s10  ;;  %p1276_p8 = scmp.ne.s32.totalorder %s1265_s13, 0 }
  0x76   : > { %929 = dma.done.wait (%p1276_p8), %s247_s1, 1088  }
  0x77   : > { %931 = vsyncadd (%p1276_p8), %s247_s1, 4294966208  ;;  %v958_v0 = vmov 0   ;;  %v778_v1 = vld [vmem:[%s250_s25 + $0x4] ss:$16 sps:$4 sm:$0xff]   ;;  %v780_v2 = vld [vmem:[%s250_s25 + $0xc] ss:$16 sps:$4 sm:$0xff]   ;;  %v306_v10 = vlaneseq }
  0x78   : > { %402 = vmatprep.mubr.bf16.mxu0 %v958_v0  ;;  %443 = vmatprep.mubr.bf16.mxu1 %v958_v0  ;;  %v782_v3 = vld [vmem:[%s250_s25] ss:$16 sps:$4 sm:$0xff]   ;;  %v783_v4 = vld [vmem:[%s250_s25 + $0x8] ss:$16 sps:$4 sm:$0xff]   ;;  %v784_v5 = vld [vmem:[%s250_s25 + $0x24] ss:$16 sps:$4 sm:$0xff]  }
  0x79   : > { %370 = vmatprep.subr.bf16.mxu0 %v778_v1  ;;  %411 = vmatprep.subr.bf16.mxu1 %v780_v2  ;;  %v786_v6 = vld [vmem:[%s250_s25 + $0x2c] ss:$16 sps:$4 sm:$0xff]   ;;  %v788_v7 = vld [vmem:[%s250_s25 + $0x20] ss:$16 sps:$4 sm:$0xff]   ;;  %v789_v8 = vld [vmem:[%s250_s25 + $0x28] ss:$16 sps:$4 sm:$0xff]  }
  0x7a   : > { %371 = vmatpush1.bf16.msra.mxu0 %v782_v3  ;;  %412 = vmatpush1.bf16.msra.mxu1 %v783_v4  ;;  %v295_v9 = vld [vmem:[#allocation2] sm:$0x1]  ;;  %vm366_vm0 = vcmask 261120   ;;  %s688_s11 = sshll.u32 %s1171_s27, 2  ;;  %v307_v11 = vshrl.u32 %v306_v10, 7  ;;  %vm486_vm1 = vcmask 1043456  }
  0x7b   : > { %372 = vmatprep.subr.bf16.mxu0 %v784_v5  ;;  %413 = vmatprep.subr.bf16.mxu1 %v786_v6  ;;  %s259_s13 = scalar_lea.vmem [#allocation7], %s688_s11  ;;  %v959_v16 = vmov 1983009808   ;;  %v960_v24 = vmov 1935823168   ;;  %s689_s15 = sshll.u32 %s1171_s27, 3 }
  0x7c   : > { %v1179_v12 = vsub.s32 0, %v307_v11  ;;  %v316_v13 = vsub.s32 2, %v307_v11  ;;  %v304_v14 = vld [vmem:[%s259_s13] sm:$0xf]  ;;  %v1181_v15 = vsub.s32 1, %v307_v11  ;;  %v461_v17 = vunpack.c.l.s4 %v959_v16  ;;  %s708_s28 = sshll.u32 %s1075_s8, 7 }
  0x7d   : > { %v320_v18 = vsub.s32 3, %v307_v11  ;;  %v477_v25 = vunpack.c.l.s4 %v960_v24  ;;  %v961_v51 = vmov 839922192   ;;  %v452_v3 = vld [vmem:[%s1251_s3] sm:$0x3]  ;;  %s290_s17 = scalar_lea.vmem [#allocation8], %s689_s15  ;;  %s1204_s29 = scalar_lea.hbm %s1253_s5, %s708_s28 }
  0x7e   : > { %373 = vmatpush1.bf16.msra.mxu0 %v788_v7  ;;  %414 = vmatpush1.bf16.msra.mxu1 %v789_v8  ;;  %v309_v19 = vrot.slane %v304_v14, %v1179_v12  ;;  %v317_v20 = vrot.slane %v304_v14, %v316_v13  ;;  %v313_v21 = vrot.slane %v304_v14, %v1181_v15  ;;  %v462_v22 = vunpack.c.0.s8 %v461_v17  ;;  %v453_v4 = vld [vmem:[%s1252_s4] sm:$0x3]  ;;  %s573_s16 = sshll.u32 %s290_s17, 4  ;;  %s559_s30 = scalar_lea.sflag [#allocation4], %s1171_s27  ;;  %s1206_s16 = int_to_ptr.vmem [resolvable:$true] %s573_s16 }
  0x7f   : > { %v321_v23 = vrot.slane %v304_v14, %v320_v18  ;;  %v478_v37 = vunpack.c.0.s8 %v477_v25  ;;  %v496_v52 = vunpack.c.l.s4 %v961_v51  ;;  %v530_v5 = vrot.slane %v452_v3, %v1179_v12  ;;  %s880_s10 = scalar_lea.vmem %s1206_s16, 128  ;;  %p1277_p4 = scmp.ne.s32.totalorder %s1266_s7, 0 }
  0x80   : > { %v465_v33 = vsub.s32 %v462_v22, %v307_v11  ;;  %v534_v6 = vrot.slane %v452_v3, %v1181_v15  ;;  %v542_v7 = vrot.slane %v453_v4, %v1179_v12  ;;  %v546_v8 = vrot.slane %v453_v4, %v1181_v15  ;;  %p881_p12 = scmp.ne.s32.totalorder %s1206_s16, %s880_s10  ;;  %s962_s8 = smov [#allocation8]  }
  0x81   : > { %698 = vmatmul.mubr.msk.bf16.vlgmr.msra.gmra.mrb[0].mxu0 %vm366_vm0, %v295_v9  ;;  %699 = vmatmul.mubr.msk.bf16.vlgmr.msra.gmra.mrb[0].mxu1 %vm366_vm0, %v295_v9  ;;  %v481_v44 = vsub.s32 %v478_v37, %v307_v11  ;;  %v497_v53 = vunpack.c.0.s8 %v496_v52  ;;  %s884_s1 = sshll.u32 %s962_s8, 4  ;;  %s885_s1 = int_to_ptr.vmem [resolvable:$false] %s884_s1 }
  0x82   : > { %v535_v10 = vcombine.low %v530_v5, %v534_v6  ;;  %v547_v14 = vcombine.low %v542_v7, %v546_v8  ;;  %p882_p0 = pnand %p881_p12, %p1277_p4  ;;  %s886_s25 = scalar_lea.vmem %s885_s1, 256 }
  0x83   : > { %v500_v54 = vsub.s32 %v497_v53, %v307_v11  ;;  %p887_p13 = scmp.lt.s32.totalorder %s1206_s16, %s885_s1  ;;  %p888_p10 = scmp.lt.s32.totalorder %s886_s25, %s880_s10 }
  0x84   : > { %p883_p11 = pneg %p882_p0 }
  0x85   : > { %p889_p3 = por %p888_p10, %p887_p13 }
  0x87   : > { %p890_p1 = pnand %p889_p3, %p883_p11 }
 0x154   : > { %v404_v26 = vpop.f32.mrb[0].mxu0  ;;  %v445_v27 = vpop.f32.mrb[0].mxu1 }
 0x155   : > { %v405_v28 = vadd.f32 %v404_v26, %v309_v19  ;;  %v446_v29 = vadd.f32 %v445_v27, %v317_v20  ;;  %v406_v30 = vpop.f32.mrb[1].mxu0  ;;  %v447_v31 = vpop.f32.mrb[1].mxu1 }
 0x156   : > { %v407_v32 = vadd.f32 %v406_v30, %v313_v21  ;;  %v448_v34 = vadd.f32 %v447_v31, %v321_v23  ;;  %v408_v35 = vpop.f32.mrb[2].mxu0  ;;  %v449_v36 = vpop.f32.mrb[2].mxu1 }
 0x157   : > { %v409_v38 = vpop.f32.mrb[3].mxu0  ;;  %v450_v39 = vpop.f32.mrb[3].mxu1 }
 0x158   : > { %v458_v40 = vcombine.low %v405_v28, %v407_v32  ;;  %v459_v41 = vcombine.low %v446_v29, %v448_v34 }
 0x15a   : > { %v466_v42 = vrot.slane %v458_v40, %v465_v33  ;;  %v473_v43 = vrot.slane %v459_v41, %v465_v33 }
 0x15c   : > { %v474_v45 = vcombine.low %v466_v42, %v473_v43 }
 0x15e   : > { %v482_v46 = vrot.slane %v474_v45, %v481_v44 }
 0x160   : > { %v484_v47 = vcombine.high %v482_v46, %v482_v46  ;;  %v487_v48 = vsel %vm486_vm1, %v482_v46, 0.0 }
 0x162   : > { %v488_v49 = vsel %vm486_vm1, %v484_v47, 0.0 }
 0x163   : > { %v489_v50 = vadd.f32 %v488_v49, %v487_v48 }
 0x165   : > { %490 = vadd.xlane.f32.xlu0 %v489_v50 }
 0x1f2   : > { %v491_v55 = vpop.xlane.xlu0 %490 }
 0x1f3   : > { %v493_v56 = vmul.f32 0.00390625, %v491_v55 }
 0x1f5   : > { %v501_v57 = vrot.slane %v493_v56, %v500_v54 }
 0x1f7   : > { %v503_v58 = vsub.f32 %v482_v46, %v501_v57 }
 0x1f9   : > { %v504_v59 = vmul.f32 %v503_v58, %v503_v58 }
 0x1fb   : > { %v506_v60 = vcombine.high %v504_v59, %v504_v59  ;;  %v508_v61 = vsel %vm486_vm1, %v504_v59, 0.0 }
 0x1fd   : > { %v509_v62 = vsel %vm486_vm1, %v506_v60, 0.0 }
 0x1fe   : > { %v510_v63 = vadd.f32 %v509_v62, %v508_v61 }
 0x200   : > { %511 = vadd.xlane.f32.xlu0 %v510_v63 }
 0x28d   : > { %v512_v0 = vpop.xlane.xlu0 %511 }
 0x28e   : > { %v513_v1 = vmul.f32 0.00390625, %v512_v0 }
 0x290   : > { %v514_v2 = vadd.f32 1e-05, %v513_v1 }
 0x292   : > { %790 = vrsqrt.f32 %v514_v2 }
 0x29c   : > { %v791_v9 = vpop.eup %790 }
 0x29d   : > { %v523_v11 = vrot.slane %v791_v9, %v500_v54 }
 0x29f   : > { %v525_v13 = vmul.f32 %v523_v11, %v503_v58 }
 0x2a1   : > { %v537_v16 = vmul.f32 %v535_v10, %v525_v13 }
 0x2a3   : > { %v549_v17 = vadd.f32 %v547_v14, %v537_v16 }
 0x2a5   : > { %700 = vst.sshfl [vmem:[%s290_s17] sm:$0xff pattern:$0x73625140] %v549_v17 }
 0x2a6   : > { %893 = shalt.err (!%p890_p1)
}
 0x2a7   : > { %s894_s27 = scalar_lea.hbm %s1204_s29, 128  ;;  %s898_s14 = scalar_lea.hbm %s1253_s5, 256 }
 0x2a8   : > { %p895_p6 = scmp.ne.s32.totalorder %s1204_s29, %s894_s27  ;;  %p899_p7 = scmp.lt.u32.totalorder %s1204_s29, %s1253_s5 }
 0x2a9   : > { %p900_p9 = scmp.lt.u32.totalorder %s898_s14, %s894_s27  ;;  %p902_p12 = scmp.lt.u32.totalorder %s894_s27, %s1204_s29 }
 0x2aa   : > { %p896_p5 = pnand %p895_p6, %p1277_p4 }
 0x2ab   : > { %p901_p8 = por %p900_p9, %p899_p7 }
 0x2ac   : > { %p897_p2 = pneg %p896_p5 }
 0x2ad   : > { %p903_p0 = por %p902_p12, %p901_p8 }
 0x2af   : > { %p904_p11 = pnand %p903_p0, %p897_p2 }
 0x2b1   : > { %907 = shalt.err (!%p904_p11)
}
 0x2b2   : > { %717 = dma.vmem_to_hbm [thread:$0]  (%p1277_p4), %s1206_s16, 128, %s1204_s29, %s559_s30  }
 0x2b3 PF: > { %s585_s12 = sand.u32 1, %s938_s18   ;;  %p1278_p13 = scmp.ne.s32.totalorder %s1267_s9, 0 }
 0x2b4   : > { %p1279_p10 = scmp.ge.s32.totalorder %s950_s21, 2  ;;  %s586_s15 = scalar_lea.sflag [#allocation4], %s585_s12 }
 0x2b6   : > { %p731_p3 = pnand %p1279_p10, %p1278_p13 }
 0x2b8   : > { %933 = dma.done.wait (!%p731_p3), %s586_s15, 128  }
 0x2b9   : > { %935 = vsyncadd (!%p731_p3), %s586_s15, 4294967168  ;;  %s1280_s28 = sld [smem:[#allocation12_spill]]  ;;  %p19_p1 = scmp.ge.s32.totalorder %s1014_s22, 4  }
 0x2ba   : > { %s1281_s18 = smov %s942_s19  ;;  %s1282_s19 = smov %s946_s20 }
 0x2bb   : > { %s1284_s21 = smov %s1014_s22  ;;  %21 = sbr.rel (!%p19_p1) target bundleno = 8 (0x8), region = 101 }
 0x2bf   : > { %s1283_s20 = smov %s1280_s28 }
 0x2c2   :  { %591 = vsyncpa [#allocation3], 1 }
 0x2c3   :  { %593 = vsyncpa [#allocation3 + $0x1], 1 }
 0x2c4   :  { %594 = vsyncpa [#allocation6], 1 }
 0x2c5   :  { %596 = vsyncpa [#allocation6 + $0x1], 1 }
 0x2c6   :  { %597 = vsyncpa [#allocation4], 1 }
 0x2c7   :  { %599 = vsyncpa [#allocation4 + $0x1], 1 }

</bundles_post_ra>
